<compile_context>
chip_gen: v7x
topology: tpu7x:2x2x1
jax: 0.10.0
libtpu: 0.0.40
codegen_flags: <defaults>
</compile_context>

<pallas_src>
import jax
import jax.numpy as jnp
from jax.experimental import pallas as pl
from jax.experimental.pallas import tpu as pltpu


def _round_up(x, m):
    return ((x + m - 1) // m) * m


def _attn_kernel(x_ref, w1_ref, b1_ref, w2_ref, b2_ref, o_ref):
    # x_ref : (C, TP)   pixel tile, pixels on the lane axis
    # w1_ref: (Ch, C)   1x1-conv #1 weights
    # b1_ref: (Ch, 1)
    # w2_ref: (Ch, 1)   1x1-conv #2 weights (out_channels = 1)
    # b2_ref: (1,)      SMEM scalar
    # o_ref : (1, TP)
    h = jnp.dot(w1_ref[...], x_ref[...],
                preferred_element_type=jnp.float32,
                precision=jax.lax.Precision.HIGHEST)      # (Ch, TP) on MXU
    h = jnp.maximum(h + b1_ref[...], 0.0)                 # bias + ReLU (VPU)
    # Second 1x1 conv: weighted SUBLANE reduction over Ch -> lane-dense (1,TP).
    # No cross-lane reduction, so a ragged/partial last pixel tile is safe
    # (garbage stays in its own lanes and those stores are masked).
    o = jnp.sum(h * w2_ref[...], axis=0, keepdims=True) + b2_ref[0]
    o_ref[...] = o.astype(o_ref.dtype)


def _pick_pixel_tile(C, Ch, P, N, itemsize):
    """Byte-sized lane tile: ~2 MiB of x per tile, VMEM- and 2-TC-aware."""
    x_tile_target = 2 << 20                              # ~2 MiB of x per buffer
    tp = (x_tile_target // (itemsize * C)) // 128 * 128
    tp = max(128, tp)
    tp = min(tp, _round_up(P, 128))                      # never exceed pixel extent

    # VMEM budget: double-buffered x + f32 h intermediate + double-buffered out.
    # Keep well under the smallest default scoped-VMEM limit (v5e: 16 MiB).
    budget = 12 << 20

    def usage(t):
        return 2 * C * t * itemsize + Ch * t * 4 + 2 * t * 4

    while tp > 128 and usage(tp) > budget:
        tp -= 128

    # v7x has 2 TensorCores per chip: make sure the parallel grid has >= 2 steps.
    if N * pl.cdiv(P, tp) < 2 and P > 128:
        tp = max(128, _round_up(pl.cdiv(P, 2), 128))
    return tp


@jax.jit
def bahdanau_attention_net(x_nchw, w1, b1, w2, b2):
    """x_nchw: (N, C, H, W).  Returns (N, 1, H, W).

    w1: (C//8, C)  -- PyTorch conv1 weight squeezed
    b1: (C//8,)
    w2: (C//8, 1)  -- PyTorch conv2 weight (1, C//8, 1, 1) transposed/squeezed
    b2: (1,)
    """
    N, C, H, W = x_nchw.shape
    Ch = w1.shape[0]
    P = H * W

    # Free reshape: pixels on the lane axis. No pad, no extra HBM pass.
    x = x_nchw.reshape(N, C, P)

    TP = _pick_pixel_tile(C, Ch, P, N, jnp.dtype(x.dtype).itemsize)
    n_ptiles = pl.cdiv(P, TP)            # ragged grid: last tile may be partial

    b1_2d = b1.reshape(Ch, 1)
    b2_1d = b2.reshape(1)

    out = pl.pallas_call(
        _attn_kernel,
        out_shape=jax.ShapeDtypeStruct((N, 1, P), x.dtype),
        grid_spec=pltpu.PrefetchScalarGridSpec(
            num_scalar_prefetch=0,
            grid=(N, n_ptiles),
            in_specs=[
                pl.BlockSpec((None, C, TP), lambda n, p: (n, 0, p)),   # x tile
                pl.BlockSpec((Ch, C), lambda n, p: (0, 0)),            # W1
                pl.BlockSpec((Ch, 1), lambda n, p: (0, 0)),            # b1
                pl.BlockSpec((Ch, 1), lambda n, p: (0, 0)),            # W2
                pl.BlockSpec(memory_space=pltpu.MemorySpace.SMEM),     # b2 scalar
            ],
            out_specs=pl.BlockSpec((None, 1, TP), lambda n, p: (n, 0, p)),
        ),
        compiler_params=pltpu.CompilerParams(
            dimension_semantics=("parallel", "parallel"),
            vmem_limit_bytes=32 * 1024 * 1024,   # <= defaults on v6e/v7x, lifts v5e 16 MiB
        ),
    )(x, w1, b1_2d, w2, b2_1d)

    return out.reshape(N, 1, H, W)       # free reshape, no slicing


def _reference(x_nchw, w1, b1, w2, b2):
    # pure-JAX reference of the 1x1-conv MLP (PyTorch Conv2d semantics)
    h = jnp.einsum("ncxy,dc->ndxy", x_nchw, w1,
                   precision=jax.lax.Precision.HIGHEST) + b1[None, :, None, None]
    h = jnp.maximum(h, 0.0)
    o = jnp.einsum("ndxy,do->noxy", h, w2,
                   precision=jax.lax.Precision.HIGHEST) + b2[None, :, None, None]
    return o


if __name__ == "__main__":
    root = jax.random.PRNGKey(0)
    key_a, key_b = jax.random.split(root)

    def make_inputs(key, N, C, H, W):
        Ch = C // 8
        kx, k1, kb1, k2, kb2 = jax.random.split(key, 5)
        x = jax.random.normal(kx, (N, C, H, W), dtype=jnp.float32)
        w1 = jax.random.normal(k1, (Ch, C), dtype=jnp.float32) * 0.1
        b1 = jax.random.normal(kb1, (Ch,), dtype=jnp.float32) * 0.1
        w2 = jax.random.normal(k2, (Ch, 1), dtype=jnp.float32) * 0.1
        b2 = jax.random.normal(kb2, (1,), dtype=jnp.float32) * 0.1
        return x, w1, b1, w2, b2

    # 1) aligned path: in_channels must be >= 8; P = 256 divides the pixel tile
    args = make_inputs(key_a, 2, 32, 16, 16)
    y = jax.block_until_ready(bahdanau_attention_net(*args))
    y_ref = _reference(*args)
    assert y.shape == (2, 1, 16, 16), y.shape
    assert jnp.allclose(y, y_ref, atol=1e-5, rtol=1e-5), "mismatch (aligned)"

    # 2) ragged path: P = 144 is not a multiple of 128 -> last pixel tile is
    #    partial (masked stores); also exercises the >=2-grid-step split.
    args2 = make_inputs(key_b, 1, 32, 12, 12)
    y2 = jax.block_until_ready(bahdanau_attention_net(*args2))
    y2_ref = _reference(*args2)
    assert y2.shape == (1, 1, 12, 12), y2.shape
    assert jnp.allclose(y2, y2_ref, atol=1e-5, rtol=1e-5), "mismatch (ragged)"

    print("KERNEL_OK")
</pallas_src>

<mosaic_0001>
module attributes {stable_mosaic.version = 11 : i64} {
  func.func @_attn_kernel(%arg0: i32, %arg1: i32, %arg2: memref<1x32x256xf32, #tpu.memory_space<vmem>>, %arg3: memref<4x32xf32, #tpu.memory_space<vmem>>, %arg4: memref<4x1xf32, #tpu.memory_space<vmem>>, %arg5: memref<4x1xf32, #tpu.memory_space<vmem>>, %arg6: memref<1xf32, #tpu.memory_space<smem>>, %arg7: memref<1x1x256xf32, #tpu.memory_space<vmem>>) attributes {dimension_semantics = [#tpu.dimension_semantics<parallel>, #tpu.dimension_semantics<parallel>], iteration_bounds = array<i64: 2, 1>, scalar_prefetch = 0 : i64, scratch_operands = 0 : i64, tpu.core_type = #tpu.core_type<tc>, window_params = [{transform_indices = @transform_0, window_bounds = array<i64: 1, 32, 256>}, {pipeline_mode = #tpu.pipeline_mode<synchronous>, transform_indices = @transform_1, window_bounds = array<i64: 4, 32>}, {pipeline_mode = #tpu.pipeline_mode<synchronous>, transform_indices = @transform_2, window_bounds = array<i64: 4, 1>}, {pipeline_mode = #tpu.pipeline_mode<synchronous>, transform_indices = @transform_3, window_bounds = array<i64: 4, 1>}, {transform_indices = @transform_4, window_bounds = array<i64: 1>}, {transform_indices = @transform_5, window_bounds = array<i64: 1, 1, 256>}]} {
    %c0 = arith.constant 0 : index
    %c0_0 = arith.constant 0 : index
    %0 = vector.load %arg3[%c0, %c0_0] : memref<4x32xf32, #tpu.memory_space<vmem>>, vector<4x32xf32>
    %c0_1 = arith.constant 0 : index
    %c0_2 = arith.constant 0 : index
    %c0_3 = arith.constant 0 : index
    %1 = vector.load %arg2[%c0_1, %c0_2, %c0_3] : memref<1x32x256xf32, #tpu.memory_space<vmem>>, vector<1x32x256xf32>
    %2 = vector.shape_cast %1 : vector<1x32x256xf32> to vector<32x256xf32>
    %cst = arith.constant dense<0.000000e+00> : vector<4x256xf32>
    %3 = tpu.matmul %0, %2, %cst {dimension_numbers = #tpu.dot_dimension_numbers<[1], [0], [0], [1], [0, 0, 1, 1], [], []>, precision = #tpu.contract_precision<fp32>} : vector<4x32xf32>, vector<32x256xf32>, vector<4x256xf32> -> vector<4x256xf32>
    %c0_4 = arith.constant 0 : index
    %c0_5 = arith.constant 0 : index
    %4 = vector.load %arg4[%c0_4, %c0_5] : memref<4x1xf32, #tpu.memory_space<vmem>>, vector<4x1xf32>
    %5 = vector.broadcast %4 : vector<4x1xf32> to vector<4x256xf32>
    %6 = arith.addf %3, %5 : vector<4x256xf32>
    %cst_6 = arith.constant 0.000000e+00 : f32
    %7 = vector.broadcast %cst_6 : f32 to vector<4x256xf32>
    %8 = arith.maximumf %6, %7 : vector<4x256xf32>
    %c0_7 = arith.constant 0 : index
    %c0_8 = arith.constant 0 : index
    %9 = vector.load %arg5[%c0_7, %c0_8] : memref<4x1xf32, #tpu.memory_space<vmem>>, vector<4x1xf32>
    %10 = vector.broadcast %9 : vector<4x1xf32> to vector<4x256xf32>
    %11 = arith.mulf %8, %10 : vector<4x256xf32>
    %cst_9 = arith.constant dense<0.000000e+00> : vector<256xf32>
    %12 = vector.multi_reduction <add>, %11, %cst_9 [0] : vector<4x256xf32> to vector<256xf32>
    %13 = vector.shape_cast %12 : vector<256xf32> to vector<1x256xf32>
    %c0_10 = arith.constant 0 : index
    %14 = memref.load %arg6[%c0_10] : memref<1xf32, #tpu.memory_space<smem>>
    %15 = vector.broadcast %14 : f32 to vector<1x256xf32>
    %16 = arith.addf %13, %15 : vector<1x256xf32>
    %c0_11 = arith.constant 0 : index
    %c0_12 = arith.constant 0 : index
    %c0_13 = arith.constant 0 : index
    %17 = vector.load %arg7[%c0_11, %c0_12, %c0_13] : memref<1x1x256xf32, #tpu.memory_space<vmem>>, vector<1x1x256xf32>
    %18 = vector.shape_cast %17 : vector<1x1x256xf32> to vector<1x256xf32>
    %19 = vector.shape_cast %16 : vector<1x256xf32> to vector<1x1x256xf32>
    tpu.vector_store %arg7[%c0_11, %c0_12, %c0_13], %19 {strides = array<i32>} : memref<1x1x256xf32, #tpu.memory_space<vmem>>, vector<1x1x256xf32>,
    return
  }
  func.func @transform_0(%arg0: i32, %arg1: i32) -> (i32, i32, i32) {
    %c0_i32 = arith.constant 0 : i32
    %c0_i32_0 = arith.constant 0 : i32
    return %arg0, %c0_i32, %arg1 : i32, i32, i32
  }
  func.func @transform_1(%arg0: i32, %arg1: i32) -> (i32, i32) {
    %c0_i32 = arith.constant 0 : i32
    %c0_i32_0 = arith.constant 0 : i32
    %c0_i32_1 = arith.constant 0 : i32
    return %c0_i32, %c0_i32_0 : i32, i32
  }
  func.func @transform_2(%arg0: i32, %arg1: i32) -> (i32, i32) {
    %c0_i32 = arith.constant 0 : i32
    %c0_i32_0 = arith.constant 0 : i32
    %c0_i32_1 = arith.constant 0 : i32
    return %c0_i32, %c0_i32_0 : i32, i32
  }
  func.func @transform_3(%arg0: i32, %arg1: i32) -> (i32, i32) {
    %c0_i32 = arith.constant 0 : i32
    %c0_i32_0 = arith.constant 0 : i32
    %c0_i32_1 = arith.constant 0 : i32
    return %c0_i32, %c0_i32_0 : i32, i32
  }
  func.func @transform_4(%arg0: i32, %arg1: i32) -> i32 {
    %c0_i32 = arith.constant 0 : i32
    %c0_i32_0 = arith.constant 0 : i32
    return %c0_i32 : i32
  }
  func.func @transform_5(%arg0: i32, %arg1: i32) -> (i32, i32, i32) {
    %c0_i32 = arith.constant 0 : i32
    %c0_i32_0 = arith.constant 0 : i32
    return %arg0, %c0_i32, %arg1 : i32, i32, i32
  }
}

</mosaic_0001>

<bundles_post_ra>
// kernel: bahdanau_attention_net.1
= control target key start
LH: loop header
LB: loop body
LE: loop exit
PB: predicated region body
PF: predicated region fallthrough
CT: control target
= control target key end

     0   :  { %s1117_s20 = smov 0   ;;  %s1119_s21 = smov 0   ;;  %s1225_s0 = inlined_call_operand.vmem [shape: f32[2,32,256], index: 0, kind: input, shape index: {}]   ;;  %s1226_s1 = inlined_call_operand.vmem [shape: f32[4,32], index: 1, kind: input, shape index: {}]   ;;  %s1227_s2 = inlined_call_operand.vmem [shape: f32[4,1], index: 2, kind: input, shape index: {}]   ;;  %s1228_s3 = inlined_call_operand.vmem [shape: f32[4,1], index: 3, kind: input, shape index: {}]   ;;  %s1229_s4 = inlined_call_operand.<no memory space> [shape: f32[1], index: 4, kind: input, shape index: {}]   ;;  %s1230_s5 = inlined_call_operand.vmem [shape: f32[2,1,256], index: 5, kind: output, shape index: {}]  }
   0x1   :  { %10 = sst [smem:[#allocation2]] %s1229_s4  ;;  %s1121_s22 = smov 0  }
   0x2 LB: > { %s28_s4 = sadd.s32 1, %s1075_s21  ;;  %p962_p0 = scmp.ge.s32.totalorder %s1079_s22, 1  ;;  %s1079_s22 = sphi %s1121_s22, %s16_s22   ;;  %s1075_s21 = sphi %s1119_s21, %s1232_s21   ;;  %s1071_s20 = sphi %s1117_s20, %s1231_s20  }
   0x3   : > { %p30_p1 = scmp.ge.s32.totalorder %s28_s4, 2  ;;  %p209_p2 = scmp.lt.s32.totalorder %s1079_s22, 3 }
   0x5   : > { %s1234_s4 = smov (%p30_p1, %s28_s4), 0  ;;  %p210_p3 = pnand %p962_p0, %p209_p2 }
   0x6   : > { %p245_p4 = scmp.lt.s32.totalorder (!%p210_p3), %s1071_s20, 1  ;;  %v263_v0 = vld [vmem:[%s1226_s1] sm:$0xf] (!%p210_p3)  ;;  %vm278_vm0 = vcmask (!%p210_p3), 261120   ;;  %v1081_v1 = vmov (!%p210_p3), 0.0   ;;  %v1082_v5 = vmov (!%p210_p3), 0  }
   0x7   : > { %213 = sbr.rel (%p210_p3) target bundleno = 291 (0x123), region = 40  ;;  %354 = vmatprep.mubr.f32.mxu1 (!%p210_p3), %v1081_v1  ;;  %639 = vmatprep.mubr.f32.mxu0 (!%p210_p3), %v1081_v1  ;;  %v280_v2 = vsel (!%p210_p3), %vm278_vm0, %v263_v0, 0  ;;  %v272_v3 = vld [vmem:[%s1227_s2] sm:$0xf] (!%p210_p3)  ;;  %vm835_vm1 = vcmask (!%p210_p3), 1043456   ;;  %s850_s8 = sld [smem:[#allocation2]] (!%p210_p3) }
   0x8   : > { %v1145_v4 = vand.u32 (!%p210_p3), 4294901760, %v280_v2  ;;  %1056 = vset.pattern.permute.xlu0 (!%p210_p3), %v1082_v5  ;;  %v827_v7 = vld [vmem:[%s1228_s3] sm:$0xf] (!%p210_p3) }
   0x9   : > { %275 = vperm.xlu0 (!%p210_p3), %1056, %v272_v3  }
   0xa   : > { %v1149_v6 = vsub.f32 (!%p210_p3), %v280_v2, %v1145_v4 }
   0xc   : > { %v357_v11 = vand.u32 (!%p210_p3), 4294901760, %v1149_v6 }
   0xd   : > { %830 = vperm.xlu0 (!%p210_p3), %1056, %v827_v7  }
   0xe   : > { %s1236_s20 = smov (!%p245_p4, %s1071_s20), 1  ;;  %v358_v23 = vsub.f32 %v1149_v6, %v357_v11 }
   0xf   : > { %s968_s27 = sshll.u32 %s1236_s20, 6  ;;  %s965_s9 = sshll.u32 %s1236_s20, 1 }
  0x10   : > { %s252_s7 = scalar_lea.vmem %s1225_s0, %s968_s27  ;;  %v359_v35 = vand.u32 4294901760, %v358_v23  ;;  %s261_s12 = scalar_lea.vmem %s1230_s5, %s965_s9 }
  0x11   : > { %v265_v8 = vld [vmem:[%s252_s7 + $0x8] sm:$0xff]  ;;  %v267_v9 = vld [vmem:[%s252_s7 + $0x18] sm:$0xff]  ;;  %v264_v10 = vld [vmem:[%s252_s7] sm:$0xff] }
  0x12   : > { %v282_v12 = vand.u32 4294901760, %v265_v8  ;;  %v286_v13 = vand.u32 4294901760, %v267_v9  ;;  %v266_v14 = vld [vmem:[%s252_s7 + $0x10] sm:$0xff]  ;;  %v284_v15 = vand.u32 4294901760, %v264_v10  ;;  %v269_v16 = vld [vmem:[%s252_s7 + $0x28] sm:$0xff]  ;;  %v271_v17 = vld [vmem:[%s252_s7 + $0x38] sm:$0xff] }
  0x13   : > { %v288_v18 = vand.u32 4294901760, %v266_v14  ;;  %v290_v19 = vand.u32 4294901760, %v269_v16  ;;  %v294_v20 = vand.u32 4294901760, %v271_v17  ;;  %v268_v21 = vld [vmem:[%s252_s7 + $0x20] sm:$0xff]  ;;  %v270_v22 = vld [vmem:[%s252_s7 + $0x30] sm:$0xff] }
  0x14   : > { %v1159_v24 = vpack.c.bf16 %v286_v13, %v282_v12  ;;  %v1161_v25 = vsub.f32 %v265_v8, %v282_v12  ;;  %v1163_v26 = vsub.f32 %v267_v9, %v286_v13  ;;  %v1165_v27 = vsub.f32 %v264_v10, %v284_v15 }
  0x15   : > { %v1167_v28 = vpack.c.bf16 %v288_v18, %v284_v15  ;;  %v1169_v29 = vsub.f32 %v266_v14, %v288_v18  ;;  %v1171_v30 = vpack.c.bf16 %v294_v20, %v290_v19  ;;  %v1173_v31 = vsub.f32 %v269_v16, %v290_v19 }
  0x16   : > { %970 = vmatprep.subr.bf16.mxu1 %v1159_v24  ;;  %994 = vmatprep.subr.bf16.mxu0 %v1159_v24  ;;  %v1177_v32 = vsub.f32 %v271_v17, %v294_v20  ;;  %v292_v33 = vand.u32 4294901760, %v268_v21  ;;  %v296_v34 = vand.u32 4294901760, %v270_v22  ;;  %v368_v36 = vand.u32 4294901760, %v1161_v25 }
  0x17   : > { %972 = vmatpush1.bf16.msra.mxu1 %v1167_v28  ;;  %996 = vmatpush1.bf16.msra.mxu0 %v1167_v28  ;;  %v380_v37 = vand.u32 4294901760, %v1163_v26  ;;  %v374_v38 = vand.u32 4294901760, %v1165_v27  ;;  %v386_v39 = vand.u32 4294901760, %v1169_v29  ;;  %v392_v43 = vand.u32 4294901760, %v1173_v31 }
  0x18   : > { %974 = vmatprep.subr.bf16.mxu1 %v1171_v30  ;;  %998 = vmatprep.subr.bf16.mxu0 %v1171_v30  ;;  %v975_v40 = vpack.c.bf16 %v296_v34, %v292_v33  ;;  %v397_v41 = vsub.f32 %v268_v21, %v292_v33  ;;  %v409_v42 = vsub.f32 %v270_v22, %v296_v34  ;;  %v404_v51 = vand.u32 4294901760, %v1177_v32 }
  0x19   : > { %v369_v44 = vsub.f32 %v1161_v25, %v368_v36  ;;  %v381_v45 = vsub.f32 %v1163_v26, %v380_v37  ;;  %v1001_v46 = vpack.c.bf16 %v380_v37, %v368_v36  ;;  %v375_v47 = vsub.f32 %v1165_v27, %v374_v38 }
  0x1a   : > { %v387_v48 = vsub.f32 %v1169_v29, %v386_v39  ;;  %v1003_v49 = vpack.c.bf16 %v386_v39, %v374_v38  ;;  %v393_v50 = vsub.f32 %v1173_v31, %v392_v43  ;;  %v398_v55 = vand.u32 4294901760, %v397_v41 }
  0x1b   : > { %976 = vmatpush1.bf16.msra.mxu1 %v975_v40  ;;  %1000 = vmatpush1.bf16.msra.mxu0 %v975_v40  ;;  %v370_v52 = vand.u32 4294901760, %v369_v44  ;;  %v382_v53 = vand.u32 4294901760, %v381_v45  ;;  %v376_v54 = vand.u32 4294901760, %v375_v47  ;;  %v405_v58 = vsub.f32 %v1177_v32, %v404_v51 }
  0x1c   : > { %1002 = vmatprep.subr.bf16.mxu0 %v1001_v46  ;;  %v388_v56 = vand.u32 4294901760, %v387_v48  ;;  %v394_v57 = vand.u32 4294901760, %v393_v50  ;;  %v1005_v59 = vpack.c.bf16 %v404_v51, %v392_v43  ;;  %v399_v61 = vsub.f32 %v397_v41, %v398_v55 }
  0x1d   : > { %v977_v60 = vpack.c.bf16 %v382_v53, %v370_v52  ;;  %v410_v62 = vand.u32 4294901760, %v409_v42  ;;  %v406_v0 = vand.u32 4294901760, %v405_v58  ;;  %v985_v9 = vpack.c.bf16 %v1163_v26, %v1161_v25 }
  0x1e   : > { %360 = vmatmul.mubr.f32.vlgmr.msra.gmra.mrb[0].mxu1 %v359_v35  ;;  %643 = vmatmul.mubr.f32.vlgmr.msra.gmra.mrb[0].mxu0 %v357_v11  ;;  %v979_v63 = vpack.c.bf16 %v388_v56, %v376_v54  ;;  %v400_v2 = vand.u32 4294901760, %v399_v61  ;;  %v987_v11 = vpack.c.bf16 %v1169_v29, %v1165_v27  ;;  %v989_v12 = vpack.c.bf16 %v1177_v32, %v1173_v31 }
  0x1f   : > { %978 = vmatprep.subr.bf16.mxu1 %v977_v60  ;;  %1004 = vmatpush1.bf16.msra.mxu0 %v1003_v49  ;;  %v411_v3 = vsub.f32 %v409_v42, %v410_v62  ;;  %v1007_v5 = vpack.c.bf16 %v410_v62, %v398_v55  ;;  %v981_v7 = vpack.c.bf16 %v406_v0, %v394_v57  ;;  %v1083_v32 = vmov 1966171168  }
  0x20   : > { %980 = vmatpush1.bf16.msra.mxu1 %v979_v63  ;;  %1006 = vmatprep.subr.bf16.mxu0 %v1005_v59  ;;  %v991_v13 = vpack.c.bf16 %v409_v42, %v397_v41  ;;  %v858_v33 = vunpack.c.l.s4 %v1083_v32  ;;  %v860_v34 = vlaneseq  ;;  %v851_v39 = vstv %s850_s8 }
  0x21   : > { %v412_v8 = vand.u32 4294901760, %v411_v3  ;;  %470 = vmatprep.mubr.f32.mxu1 %v1081_v1  ;;  %737 = vmatprep.mubr.f32.mxu0 %v1081_v1 }
  0x22   : > { %982 = vmatprep.subr.bf16.mxu1 %v981_v7  ;;  %v861_v41 = vshrl.u32 %v860_v34, 7  ;;  %vm874_vm2 = vcmp.lt.s32.totalorder %v860_v34, 256 }
  0x23   : > { %v983_v10 = vpack.c.bf16 %v412_v8, %v400_v2  ;;  %1008 = vmatpush1.bf16.msra.mxu0 %v1007_v5 }
  0x24   : > { %1010 = vmatprep.subr.bf16.mxu0 %v1159_v24 }
  0x25   : > { %984 = vmatpush1.bf16.msra.mxu1 %v983_v10 }
  0x26   : > { %986 = vmatprep.subr.bf16.mxu1 %v985_v9  ;;  %739 = vmatmul.mubr.f32.vlgmr.msra.gmra.mrb[0].mxu0 %v1145_v4 }
  0x27   : > { %1012 = vmatpush1.bf16.msra.mxu0 %v1167_v28  ;;  %817 = vmatprep.mubr.f32.mxu0 %v1081_v1 }
  0x28   : > { %472 = vmatmul.mubr.f32.vlgmr.msra.gmra.mrb[0].mxu1 %v1145_v4  ;;  %1014 = vmatprep.subr.bf16.mxu0 %v1171_v30 }
  0x29   : > { %988 = vmatpush1.bf16.msra.mxu1 %v987_v11  ;;  %558 = vmatprep.mubr.f32.mxu1 %v1081_v1 }
  0x2a   : > { %990 = vmatprep.subr.bf16.mxu1 %v989_v12 }
  0x2b   : > { %1016 = vmatpush1.bf16.msra.mxu0 %v975_v40  ;;  %v859_v40 = vunpack.c.0.s8 %v858_v33 }
  0x2d   : > { %992 = vmatpush1.bf16.msra.mxu1 %v991_v13  ;;  %v862_v46 = vsub.s32 %v859_v40, %v861_v41 }
  0x2e   : > { %819 = vmatmul.mubr.f32.vlgmr.msra.gmra.mrb[0].mxu0 %v1145_v4 }
  0x30   : > { %561 = vmatmul.mubr.f32.vlgmr.msra.gmra.mrb[0].mxu1 %v1149_v6 }
  0x88   : > { %v276_v16 = vpop.permute.xlu0 %275 }
  0x8c   : > { %v831_v1 = vpop.permute.xlu0 %830 }
 0x101   : > { %v820_v14 = vpop.f32.mrb[0].mxu0 }
 0x102   : > { %v822_v15 = vpop.f32.mrb[1].mxu0 }
 0x103   : > { %v562_v17 = vpop.f32.mrb[0].mxu1 }
 0x104   : > { %v1017_v18 = vadd.f32 %v562_v17, %v276_v16  ;;  %v564_v19 = vpop.f32.mrb[1].mxu1 }
 0x105   : > { %v1019_v20 = vadd.f32 %v564_v19, %v276_v16 }
 0x106   : > { %v1018_v21 = vadd.f32 %v1017_v18, %v820_v14 }
 0x107   : > { %v1020_v22 = vadd.f32 %v1019_v20, %v822_v15 }
 0x108   : > { %v825_v23 = vmax.f32 %v1018_v21, 0.0 }
 0x109   : > { %v826_v24 = vmax.f32 %v1020_v22, 0.0 }
 0x10a   : > { %v833_v25 = vmul.f32 %v831_v1, %v825_v23 }
 0x10b   : > { %v834_v26 = vmul.f32 %v831_v1, %v826_v24 }
 0x10c   : > { %v836_v27 = vsel %vm835_vm1, %v833_v25, 0.0 }
 0x10d   : > { %v837_v28 = vrot.slane %v836_v27, 4  ;;  %v843_v4 = vsel %vm835_vm1, %v834_v26, 0.0 }
 0x10e   : > { %v844_v6 = vrot.slane %v843_v4, 4 }
 0x10f   : > { %v838_v29 = vadd.f32 %v837_v28, %v836_v27 }
 0x110   : > { %v845_v30 = vadd.f32 %v844_v6, %v843_v4 }
 0x111   : > { %v839_v31 = vrot.slane %v838_v29, 2 }
 0x112   : > { %v846_v35 = vrot.slane %v845_v30, 2 }
 0x113   : > { %v840_v36 = vadd.f32 %v839_v31, %v838_v29 }
 0x114   : > { %v847_v37 = vadd.f32 %v846_v35, %v845_v30 }
 0x115   : > { %v841_v38 = vrot.slane %v840_v36, 1 }
 0x116   : > { %v848_v42 = vrot.slane %v847_v37, 1 }
 0x117   : > { %v842_v43 = vadd.f32 %v841_v38, %v840_v36 }
 0x118   : > { %v849_v44 = vadd.f32 %v848_v42, %v847_v37 }
 0x119   : > { %v852_v45 = vadd.f32 %v851_v39, %v842_v43 }
 0x11a   : > { %v853_v47 = vadd.f32 %v851_v39, %v849_v44 }
 0x11c   : > { %v856_v48 = vcombine.low %v852_v45, %v853_v47 }
 0x11e   : > { %v863_v49 = vrot.slane %v856_v48, %v862_v46 }
 0x120   : > { %v870_v50 = vrot.slane %v863_v49, %v862_v46 }
 0x122   : > { %876 = vst.msk [vmem:[%s261_s12] sm:$0x3] %vm874_vm2, %v870_v50 }
 0x123 PF: > { %s16_s22 = sadd.s32 1, %s1079_s22   ;;  %s1231_s20 = smov %s1075_s21 }
 0x124   : > { %p13_p5 = scmp.ge.s32.totalorder %s16_s22, 4   ;;  %s1232_s21 = smov %s1234_s4 }
 0x126   :  { %15 = sbr.rel (!%p13_p5) target bundleno = 2 (0x2), region = 70 }

</bundles_post_ra>
